<compile_context>
chip_gen: v6e
topology: v6e:2x2x1
jax: 0.10.0
libtpu: 0.0.40
codegen_flags: <defaults>
</compile_context>

<pallas_src>
import jax
import jax.numpy as jnp
from jax.experimental import pallas as pl
from jax.experimental.pallas import tpu as pltpu


def _scalar_copy_kernel(const_ref, out_ref):
    # const_ref / out_ref: f32[1] in SMEM.  Trivial scalar pass-through.
    out_ref[0] = const_ref[0]


@jax.jit
def scalar_forward_pallas(constant_1d: jax.Array) -> jax.Array:
    """Parity-only Pallas version of Scalar.forward().

    Args:
      constant_1d: the learnable scalar parameter, shape (1,), float32.
    Returns:
      A (1,) float32 array equal to `constant_1d`.
    """
    return pl.pallas_call(
        _scalar_copy_kernel,
        out_shape=jax.ShapeDtypeStruct((1,), jnp.float32),
        in_specs=[pl.BlockSpec(memory_space=pltpu.SMEM)],
        out_specs=pl.BlockSpec(memory_space=pltpu.SMEM),
        # No input_output_aliases: donating the 4-byte parameter buffer buys
        # nothing and creates a buffer-donation hazard on repeated calls.
    )(constant_1d)


class Scalar:
    """JAX port of the PyTorch `Scalar` module.

    The forward pass (`__call__`) returns the parameter directly — no kernel
    dispatch.  `forward_pallas()` exercises the parity kernel and returns an
    identically-shaped 0-d float32 scalar.
    """

    def __init__(self, init_value: float) -> None:
        # Deterministic parameter init: exactly the provided init_value,
        # mirroring nn.Parameter(torch.tensor(init_value, dtype=torch.float32)).
        self.constant = jnp.asarray(init_value, dtype=jnp.float32)  # 0-d scalar
        # Pre-shaped ONCE for the parity kernel (no per-call reshape around
        # the custom call).
        self._constant_1d = self.constant.reshape(1)

    def __call__(self) -> jax.Array:
        # Hot path: just hand back the existing buffer (zero cost).
        return self.constant

    def forward_pallas(self) -> jax.Array:
        # Parity path: jit-cached SMEM pass-through kernel; squeeze back to a
        # 0-d scalar so both paths have identical shape/dtype.
        return scalar_forward_pallas(self._constant_1d).reshape(())


if __name__ == "__main__":
    # Deterministic "example input": the init value for the scalar parameter.
    key = jax.random.PRNGKey(0)
    init_value = float(jax.random.normal(key, ()))  # deterministic init value

    module = Scalar(init_value)

    # Fast path (the recommended forward): direct parameter return.
    out_direct = jax.block_until_ready(module())
    assert out_direct.shape == ()
    assert out_direct.dtype == jnp.float32
    assert jnp.allclose(out_direct, jnp.float32(init_value))

    # Parity path: run the Pallas kernel (jit-cached) and block on it.
    out_kernel = jax.block_until_ready(module.forward_pallas())
    assert out_kernel.shape == ()
    assert out_kernel.dtype == jnp.float32
    assert jnp.allclose(out_kernel, jnp.float32(init_value))
    assert jnp.allclose(out_kernel, out_direct)

    # Call it again to verify there is no buffer-donation hazard (no aliasing).
    out_kernel2 = jax.block_until_ready(module.forward_pallas())
    assert jnp.allclose(out_kernel2, out_direct)

    print("KERNEL_OK")
</pallas_src>

<mosaic_0001>
module attributes {stable_mosaic.version = 11 : i64} {
  func.func @_scalar_copy_kernel(%arg0: memref<1xf32, #tpu.memory_space<smem>>, %arg1: memref<1xf32, #tpu.memory_space<smem>>) attributes {dimension_semantics = [], scalar_prefetch = 0 : i64, scratch_operands = 0 : i64, tpu.core_type = #tpu.core_type<tc>} {
    %c0 = arith.constant 0 : index
    %0 = memref.load %arg0[%c0] : memref<1xf32, #tpu.memory_space<smem>>
    %c0_0 = arith.constant 0 : index
    %1 = memref.load %arg1[%c0_0] : memref<1xf32, #tpu.memory_space<smem>>
    memref.store %0, %arg1[%c0_0] : memref<1xf32, #tpu.memory_space<smem>>
    return
  }
}

</mosaic_0001>

<bundles_post_ra>
// kernel: scalar_forward_pallas.1
= control target key start
LH: loop header
LB: loop body
LE: loop exit
PB: predicated region body
PF: predicated region fallthrough
CT: control target
= control target key end

     0   :  { %7 = vsyncpa [#allocation4], 0  ;;  %s37_s8 = smov [#allocation3]   ;;  %s54_s0 = inlined_call_operand.<no memory space> [shape: f32[1], index: 0, kind: input, shape index: {}]   ;;  %s55_s1 = inlined_call_operand.hbm [shape: f32[1], index: 1, kind: output, shape index: {}]  }
   0x1   :  { %12 = sst [smem:[#allocation3]] %s54_s0 }
   0x2   :  { %20 = dma.smem_to_hbm %s37_s8, 16, %s55_s1, [#allocation4]  }
   0x3   :  { %35 = dma.done.wait [#allocation4], 16  }
   0x4   :  { %36 = vsyncadd [#allocation4], 4294967280 }
   0x5   :  { %24 = sfence }
   0x6   :  { %25 = vsyncpa [#allocation4], 1 }

</bundles_post_ra>
